<compile_context>
chip_gen: v5e
topology: v5e:2x2
jax: 0.10.0
libtpu: 0.0.40
codegen_flags: <defaults>
</compile_context>

<pallas_src>
import functools

import jax
import jax.numpy as jnp
from jax.experimental import pallas as pl
from jax.experimental.pallas import tpu as pltpu


# ---------------------------------------------------------------------------
# Chip queries (robust: conservative fallbacks if unavailable).
# ---------------------------------------------------------------------------
def _vmem_capacity_bytes():
    try:
        info = pltpu.get_tpu_info()
        cap = getattr(info, "vmem_capacity_bytes", None)
        if cap:
            return int(cap)
    except Exception:
        pass
    return 64 << 20  # safe lower bound across v5e / v6e / v7x


def _num_splits():
    """2-way batch split only on chips with >1 TensorCore per device (v7x).

    v5e/v6e have a single TC, where a split axis is just a sequential loop
    that adds an accumulator writeback and possibly a redundant tail-tile DMA.
    """
    try:
        kind = jax.devices()[0].device_kind.lower()
    except Exception:
        return 1
    return 2 if "v7" in kind else 1


# ---------------------------------------------------------------------------
# Kernels.
# ---------------------------------------------------------------------------
def _row_terms(fc_ref, label_ref, tval_ref, *, n_rows, block_rows, num_splits):
    """Per-row smoothed log-prob of the labelled class, with tail-row masking.

    Returns (logp, valid): (TM, 1) f32 and (TM, 1) bool.
    """
    ci = pl.program_id(0)
    i = pl.program_id(1)
    tile_idx = i * num_splits + ci           # interleaved tile->split assignment

    x = fc_ref[...].astype(jnp.float32)      # (TM, C) upcast in-register
    lab = label_ref[...]                     # (TM, 1) int32
    tval = tval_ref[...].astype(jnp.float32)  # (TM, 1)

    tm = x.shape[0]
    row = jax.lax.broadcasted_iota(jnp.int32, (tm, 1), 0) + tile_idx * block_rows
    valid = row < n_rows                     # masks tail rows & clamped tiles

    # scatter_(1, label, tval) expressed as a mask; gather of x[label] likewise.
    col = jax.lax.broadcasted_iota(jnp.int32, x.shape, 1)
    onehot = col == lab                      # (TM, C) bool

    # log(sum(onehot * tval * softmax(x))) == log(tval) + x[label] - m - lse
    m = jnp.max(x, axis=1, keepdims=True)                              # (TM,1)
    lse = jnp.log(jnp.sum(jnp.exp(x - m), axis=1, keepdims=True))      # (TM,1)
    x_lab = jnp.sum(jnp.where(onehot, x, 0.0), axis=1, keepdims=True)  # (TM,1)
    logp = jnp.log(tval) + x_lab - m - lse
    logp = jnp.where(valid, logp, 0.0)       # zero (and NaN-proof) invalid rows
    return logp, valid


def _ce_smooth_kernel(fc_ref, label_ref, tval_ref, out_ref, *,
                      n_rows, block_rows, num_splits):
    """Unweighted path: accumulate sum(log p) per batch split."""
    i = pl.program_id(1)

    @pl.when(i == 0)
    def _():
        out_ref[...] = jnp.zeros_like(out_ref)

    logp, _ = _row_terms(fc_ref, label_ref, tval_ref,
                         n_rows=n_rows, block_rows=block_rows,
                         num_splits=num_splits)
    out_ref[...] = out_ref[...] + jnp.sum(logp)


def _ce_smooth_weighted_kernel(fc_ref, label_ref, tval_ref, wce_ref,
                               num_ref, den_ref, *,
                               n_rows, block_rows, num_splits):
    """Weighted path: accumulate sum(w_ce*log p) and sum(w_ce) per split.

    w_ce = weight[label] is gathered in the wrapper and streamed per row.
    """
    i = pl.program_id(1)

    @pl.when(i == 0)
    def _():
        num_ref[...] = jnp.zeros_like(num_ref)
        den_ref[...] = jnp.zeros_like(den_ref)

    logp, valid = _row_terms(fc_ref, label_ref, tval_ref,
                             n_rows=n_rows, block_rows=block_rows,
                             num_splits=num_splits)
    wce = jnp.where(valid, wce_ref[...].astype(jnp.float32), 0.0)  # (TM, 1)
    num_ref[...] = num_ref[...] + jnp.sum(wce * logp)
    den_ref[...] = den_ref[...] + jnp.sum(wce)


# ---------------------------------------------------------------------------
# Tiling.
# ---------------------------------------------------------------------------
def _pick_block_rows(n, c, itemsize, num_splits, vmem_cap, n_aux):
    """Largest sublane-multiple row tile whose *padded* VMEM footprint fits the
    per-pipeline-stage budget (double-buffered by BlockSpec pipelining)."""
    c_pad = -(-c // 128) * 128
    # Per-row VMEM footprint of one stage: lane-padded fc row + lane-padded
    # (rows, 1) per-row scalar blocks (each pads to 128 f32 lanes).
    bytes_per_row = c_pad * itemsize + n_aux * 128 * 4
    # Per-stage budget: 2 stages in flight must stay well inside scoped VMEM.
    target_stage_bytes = min(8 << 20, max(1 << 20, vmem_cap // 8))
    rows = max(8, target_stage_bytes // bytes_per_row)
    per_split = -(-n // num_splits)
    per_split_pad = -(-per_split // 8) * 8
    rows = min(rows, max(8, per_split_pad))
    return max(8, (rows // 8) * 8)


# ---------------------------------------------------------------------------
# Wrapper.
# ---------------------------------------------------------------------------
def cross_entropy_loss_smooth(fc_out, label, target_value, weight=None,
                              *, block_rows=None):
    n, c = fc_out.shape
    itemsize = fc_out.dtype.itemsize
    lab2 = label.reshape(n, 1).astype(jnp.int32)
    tval2 = target_value.reshape(n, 1).astype(jnp.float32)

    num_splits = _num_splits()
    vmem_cap = _vmem_capacity_bytes()
    n_aux = 2 if weight is None else 3  # label, tval [, w_ce]
    if block_rows is None:
        block_rows = _pick_block_rows(n, c, itemsize, num_splits, vmem_cap, n_aux)
    assert block_rows % 8 == 0

    total_tiles = -(-n // block_rows)
    tiles_per_split = -(-total_tiles // num_splits)
    grid = (num_splits, tiles_per_split)
    max_block = total_tiles - 1  # clamp fully out-of-range (masked) tail tiles

    def row_block(ci, i):
        return (jnp.minimum(i * num_splits + ci, max_block), 0)

    fc_spec = pl.BlockSpec((block_rows, c), row_block)
    aux_spec = pl.BlockSpec((block_rows, 1), row_block)
    # Lane-dense per-split accumulator block, resident across the row axis.
    acc_spec = pl.BlockSpec((1, 8, 128), lambda ci, i: (ci, 0, 0))
    acc_shape = jax.ShapeDtypeStruct((num_splits, 8, 128), jnp.float32)

    # Explicit scoped-VMEM limit: double-buffered fc + per-row scalar tiles
    # (lane-padded), resident accumulators, plus margin.
    c_pad = -(-c // 128) * 128
    fc_tile_vmem = block_rows * c_pad * itemsize
    aux_tile_vmem = block_rows * 128 * 4
    acc_vmem = 2 * num_splits * 8 * 128 * 4
    needed = 2 * (fc_tile_vmem + n_aux * aux_tile_vmem) + acc_vmem + (4 << 20)
    vmem_limit = max(needed, 32 << 20)
    vmem_limit = min(vmem_limit, max(vmem_cap - (8 << 20), 16 << 20))

    params = pltpu.CompilerParams(
        dimension_semantics=("parallel", "arbitrary"),
        vmem_limit_bytes=int(vmem_limit))

    # Pure-bandwidth kernel: give XLA the real traffic/transcendental counts.
    cost = pl.CostEstimate(
        flops=int(5 * n * c),
        transcendentals=int(n * c + 2 * n),
        bytes_accessed=int(n * c * itemsize + n * 4 * n_aux
                           + (1 if weight is None else 2) * num_splits * 8 * 128 * 4))

    if weight is None:
        kernel = functools.partial(
            _ce_smooth_kernel, n_rows=n, block_rows=block_rows,
            num_splits=num_splits)
        partial_logp = pl.pallas_call(
            kernel,
            grid=grid,
            in_specs=[fc_spec, aux_spec, aux_spec],
            out_specs=acc_spec,
            out_shape=acc_shape,
            compiler_params=params,
            cost_estimate=cost,
        )(fc_out, lab2, tval2)
        total = jnp.sum(partial_logp[:, 0, 0])
        return -total / n + 0.0001
    else:
        # weight[label] gather hoisted to the wrapper (O(N)); streamed per row.
        wce2 = weight.astype(jnp.float32)[label].reshape(n, 1)
        kernel = functools.partial(
            _ce_smooth_weighted_kernel, n_rows=n, block_rows=block_rows,
            num_splits=num_splits)
        num_p, den_p = pl.pallas_call(
            kernel,
            grid=grid,
            in_specs=[fc_spec, aux_spec, aux_spec, aux_spec],
            out_specs=(acc_spec, acc_spec),
            out_shape=(acc_shape, acc_shape),
            compiler_params=params,
            cost_estimate=cost,
        )(fc_out, lab2, tval2, wce2)
        num = jnp.sum(num_p[:, 0, 0])
        den = jnp.sum(den_p[:, 0, 0])
        return -num / den


def _reference_loss(fc_out, label, target_value, weight=None):
    """Pure-JAX reference mirroring the PyTorch module."""
    n, c = fc_out.shape
    one_hot = jnp.zeros((n, c), jnp.float32).at[jnp.arange(n), label].set(
        target_value.astype(jnp.float32))
    sm = jax.nn.softmax(fc_out.astype(jnp.float32), axis=1)
    loss = one_hot * sm
    if weight is None:
        return -jnp.sum(jnp.log(jnp.sum(loss, axis=1))) / n + 0.0001
    w_ce = weight[label]
    loss_index = jnp.log(jnp.sum(loss, axis=1))
    return -jnp.sum(w_ce * loss_index) / jnp.sum(w_ce)


if __name__ == "__main__":
    key = jax.random.PRNGKey(0)
    k1, k2, k3, k4 = jax.random.split(key, 4)

    N, C = 16, 16  # batch, num classes
    fc_out = jax.random.normal(k1, (N, C), dtype=jnp.float32)
    label = jax.random.randint(k2, (N,), 0, C, dtype=jnp.int32)
    # smoothed target values (the module scatters these into the one-hot rows)
    target_value = jax.random.uniform(k3, (N,), dtype=jnp.float32,
                                      minval=0.7, maxval=1.0)
    # deterministic per-class weights for the weighted branch
    weight = jax.random.uniform(k4, (C,), dtype=jnp.float32,
                                minval=0.5, maxval=1.5)

    # Unweighted branch
    out = cross_entropy_loss_smooth(fc_out, label, target_value)
    out = jax.block_until_ready(out)
    ref = _reference_loss(fc_out, label, target_value)
    assert jnp.allclose(out, ref, rtol=1e-5, atol=1e-5), (out, ref)

    # Weighted branch
    out_w = cross_entropy_loss_smooth(fc_out, label, target_value, weight)
    out_w = jax.block_until_ready(out_w)
    ref_w = _reference_loss(fc_out, label, target_value, weight)
    assert jnp.allclose(out_w, ref_w, rtol=1e-5, atol=1e-5), (out_w, ref_w)

    print("KERNEL_OK")
</pallas_src>

<mosaic_0001>
module attributes {stable_mosaic.version = 11 : i64} {
  func.func @_ce_smooth_kernel(%arg0: i32, %arg1: i32, %arg2: memref<16x16xf32, #tpu.memory_space<vmem>>, %arg3: memref<16x1xi32, #tpu.memory_space<vmem>>, %arg4: memref<16x1xf32, #tpu.memory_space<vmem>>, %arg5: memref<1x8x128xf32, #tpu.memory_space<vmem>>) attributes {dimension_semantics = [#tpu.dimension_semantics<parallel>, #tpu.dimension_semantics<arbitrary>], iteration_bounds = array<i64: 1, 1>, scalar_prefetch = 0 : i64, scratch_operands = 0 : i64, tpu.core_type = #tpu.core_type<tc>, window_params = [{transform_indices = @transform_0, window_bounds = array<i64: 16, 16>}, {transform_indices = @transform_1, window_bounds = array<i64: 16, 1>}, {transform_indices = @transform_2, window_bounds = array<i64: 16, 1>}, {transform_indices = @transform_3, window_bounds = array<i64: 1, 8, 128>}]} {
    %c0_i32 = arith.constant 0 : i32
    %0 = arith.cmpi eq, %arg1, %c0_i32 : i32
    %1 = arith.extui %0 : i1 to i32
    %c0_i32_0 = arith.constant 0 : i32
    %2 = arith.cmpi ne, %1, %c0_i32_0 : i32
    scf.if %2 {
      %cst_18 = arith.constant 0.000000e+00 : f32
      %43 = vector.broadcast %cst_18 : f32 to vector<1x8x128xf32>
      %c0_19 = arith.constant 0 : index
      %c0_20 = arith.constant 0 : index
      %c0_21 = arith.constant 0 : index
      %44 = vector.load %arg5[%c0_19, %c0_20, %c0_21] : memref<1x8x128xf32, #tpu.memory_space<vmem>>, vector<1x8x128xf32>
      tpu.vector_store %arg5[%c0_19, %c0_20, %c0_21], %43 {strides = array<i32>} : memref<1x8x128xf32, #tpu.memory_space<vmem>>, vector<1x8x128xf32>,
    } else {
    }
    %c1_i32 = arith.constant 1 : i32
    %3 = arith.muli %arg1, %c1_i32 : i32
    %4 = arith.addi %3, %arg0 : i32
    %c0 = arith.constant 0 : index
    %c0_1 = arith.constant 0 : index
    %5 = vector.load %arg2[%c0, %c0_1] : memref<16x16xf32, #tpu.memory_space<vmem>>, vector<16x16xf32>
    %c0_2 = arith.constant 0 : index
    %c0_3 = arith.constant 0 : index
    %6 = vector.load %arg3[%c0_2, %c0_3] : memref<16x1xi32, #tpu.memory_space<vmem>>, vector<16x1xi32>
    %c0_4 = arith.constant 0 : index
    %c0_5 = arith.constant 0 : index
    %7 = vector.load %arg4[%c0_4, %c0_5] : memref<16x1xf32, #tpu.memory_space<vmem>>, vector<16x1xf32>
    %8 = tpu.iota {dimensions = array<i32: 0>} : vector<16x1xi32>
    %c16_i32 = arith.constant 16 : i32
    %9 = arith.muli %4, %c16_i32 : i32
    %10 = vector.broadcast %9 : i32 to vector<16x1xi32>
    %11 = arith.addi %8, %10 : vector<16x1xi32>
    %c16_i32_6 = arith.constant 16 : i32
    %12 = vector.broadcast %c16_i32_6 : i32 to vector<16x1xi32>
    %13 = arith.cmpi slt, %11, %12 : vector<16x1xi32>
    %14 = tpu.iota {dimensions = array<i32: 1>} : vector<16x16xi32>
    %15 = vector.broadcast %6 : vector<16x1xi32> to vector<16x16xi32>
    %16 = arith.cmpi eq, %14, %15 : vector<16x16xi32>
    %cst = arith.constant dense<0xFF800000> : vector<16xf32>
    %17 = vector.multi_reduction <maximumf>, %5, %cst [1] : vector<16x16xf32> to vector<16xf32>
    %18 = vector.shape_cast %17 : vector<16xf32> to vector<16x1xf32>
    %19 = vector.broadcast %18 : vector<16x1xf32> to vector<16x16xf32>
    %20 = arith.subf %5, %19 : vector<16x16xf32>
    %21 = math.exp %20 : vector<16x16xf32>
    %cst_7 = arith.constant dense<0.000000e+00> : vector<16xf32>
    %22 = vector.multi_reduction <add>, %21, %cst_7 [1] : vector<16x16xf32> to vector<16xf32>
    %23 = vector.shape_cast %22 : vector<16xf32> to vector<16x1xf32>
    %24 = math.log %23 : vector<16x1xf32>
    %cst_8 = arith.constant 0.000000e+00 : f32
    %25 = vector.broadcast %cst_8 : f32 to vector<16x16xf32>
    %26 = arith.select %16, %5, %25 : vector<16x16xi1>, vector<16x16xf32>
    %cst_9 = arith.constant dense<0.000000e+00> : vector<16xf32>
    %27 = vector.multi_reduction <add>, %26, %cst_9 [1] : vector<16x16xf32> to vector<16xf32>
    %28 = vector.shape_cast %27 : vector<16xf32> to vector<16x1xf32>
    %29 = math.log %7 : vector<16x1xf32>
    %30 = arith.addf %29, %28 : vector<16x1xf32>
    %31 = arith.subf %30, %18 : vector<16x1xf32>
    %32 = arith.subf %31, %24 : vector<16x1xf32>
    %cst_10 = arith.constant 0.000000e+00 : f32
    %33 = vector.broadcast %cst_10 : f32 to vector<16x1xf32>
    %34 = arith.select %13, %32, %33 : vector<16x1xi1>, vector<16x1xf32>
    %c0_11 = arith.constant 0 : index
    %c0_12 = arith.constant 0 : index
    %c0_13 = arith.constant 0 : index
    %35 = vector.load %arg5[%c0_11, %c0_12, %c0_13] : memref<1x8x128xf32, #tpu.memory_space<vmem>>, vector<1x8x128xf32>
    %36 = vector.shape_cast %34 : vector<16x1xf32> to vector<1x16x1xf32>
    %cst_14 = arith.constant dense<0.000000e+00> : vector<1xf32>
    %37 = vector.multi_reduction <add>, %36, %cst_14 [1, 2] : vector<1x16x1xf32> to vector<1xf32>
    %38 = vector.shape_cast %37 : vector<1xf32> to vector<1x1x1xf32>
    %39 = vector.extract %38[0, 0, 0] : f32 from vector<1x1x1xf32>
    %40 = vector.broadcast %39 : f32 to vector<1x8x128xf32>
    %41 = arith.addf %35, %40 : vector<1x8x128xf32>
    %c0_15 = arith.constant 0 : index
    %c0_16 = arith.constant 0 : index
    %c0_17 = arith.constant 0 : index
    %42 = vector.load %arg5[%c0_15, %c0_16, %c0_17] : memref<1x8x128xf32, #tpu.memory_space<vmem>>, vector<1x8x128xf32>
    tpu.vector_store %arg5[%c0_15, %c0_16, %c0_17], %41 {strides = array<i32>} : memref<1x8x128xf32, #tpu.memory_space<vmem>>, vector<1x8x128xf32>,
    return
  }
  func.func @transform_0(%arg0: i32, %arg1: i32) -> (i32, i32) {
    %c1_i32 = arith.constant 1 : i32
    %0 = arith.muli %arg1, %c1_i32 : i32
    %1 = arith.addi %0, %arg0 : i32
    %c0_i32 = arith.constant 0 : i32
    %2 = arith.minsi %1, %c0_i32 : i32
    %c0_i32_0 = arith.constant 0 : i32
    %c0_i32_1 = arith.constant 0 : i32
    return %2, %c0_i32_0 : i32, i32
  }
  func.func @transform_1(%arg0: i32, %arg1: i32) -> (i32, i32) {
    %c1_i32 = arith.constant 1 : i32
    %0 = arith.muli %arg1, %c1_i32 : i32
    %1 = arith.addi %0, %arg0 : i32
    %c0_i32 = arith.constant 0 : i32
    %2 = arith.minsi %1, %c0_i32 : i32
    %c0_i32_0 = arith.constant 0 : i32
    %c0_i32_1 = arith.constant 0 : i32
    return %2, %c0_i32_0 : i32, i32
  }
  func.func @transform_2(%arg0: i32, %arg1: i32) -> (i32, i32) {
    %c1_i32 = arith.constant 1 : i32
    %0 = arith.muli %arg1, %c1_i32 : i32
    %1 = arith.addi %0, %arg0 : i32
    %c0_i32 = arith.constant 0 : i32
    %2 = arith.minsi %1, %c0_i32 : i32
    %c0_i32_0 = arith.constant 0 : i32
    %c0_i32_1 = arith.constant 0 : i32
    return %2, %c0_i32_0 : i32, i32
  }
  func.func @transform_3(%arg0: i32, %arg1: i32) -> (i32, i32, i32) {
    %c0_i32 = arith.constant 0 : i32
    %c0_i32_0 = arith.constant 0 : i32
    %c0_i32_1 = arith.constant 0 : i32
    return %arg0, %c0_i32, %c0_i32_0 : i32, i32, i32
  }
}

</mosaic_0001>

<bundles_post_ra>
// kernel: tpu_custom_call.1
= control target key start
LH: loop header
LB: loop body
LE: loop exit
PB: predicated region body
PF: predicated region fallthrough
CT: control target
= control target key end

     0   :  { %vm142_vm0 = vcmask 130048   ;;  %v281_v2 = vmov 0   ;;  %s330_s0 = inlined_call_operand.vmem [shape: f32[16,16], index: 0, kind: input, shape index: {}]   ;;  %s331_s1 = inlined_call_operand.vmem [shape: s32[16,1], index: 1, kind: input, shape index: {}]   ;;  %s332_s2 = inlined_call_operand.vmem [shape: f32[16,1], index: 2, kind: input, shape index: {}]   ;;  %s333_s3 = inlined_call_operand.hbm [shape: f32[1,8,128], index: 3, kind: output, shape index: {}]  }
   0x1   :  { %v119_v0 = vld [vmem:[%s331_s1] sm:$0xff]  ;;  %241 = vset.pattern.permute.xlu1 %v281_v2  ;;  %242 = vset.pattern.permute.xlu0 %v281_v2 }
   0x2   :  { %v117_v1 = vld [vmem:[%s330_s0] sm:$0xff] }
   0x3   :  { %v143_v3 = vsel %vm142_vm0, %v117_v1, -inf }
   0x4   :  { %8 = vsyncpa [#allocation3], 0  ;;  %135 = vperm.xlu1 %241, %v119_v0   ;;  %144 = vmax.xlane.f32.xlu0 %v143_v3  ;;  %v118_v4 = vld [vmem:[%s330_s0 + $0x8] sm:$0xff]  ;;  %v132_v7 = vlaneseq  ;;  %v121_v25 = vld [vmem:[%s332_s2] sm:$0xff]  ;;  %vm186_vm3 = vcmask 7168   ;;  %s209_s25 = sshll.u32 %s333_s3, 4  ;;  %s210_s25 = int_to_ptr.hbm [resolvable:$true] %s209_s25 }
   0x5   :  { %v120_v5 = vld [vmem:[%s331_s1 + $0x8] sm:$0xff]  ;;  %v146_v6 = vsel %vm142_vm0, %v118_v4, -inf }
   0x6   :  { %v133_v8 = vand.u32 127, %v132_v7  ;;  %v122_v26 = vld [vmem:[%s332_s2 + $0x8] sm:$0xff]  ;;  %s282_s2 = smov [#allocation2]  }
   0x7   :  { %s207_s22 = sshll.u32 %s282_s2, 4  ;;  %s208_s22 = int_to_ptr.vmem [resolvable:$true] %s207_s22 }
   0xc   :  { %138 = vperm.xlu1 %241, %v120_v5   ;;  %147 = vmax.xlane.f32.xlu0 %v146_v6 }
  0x76   :  { %v136_v9 = vpop.permute.xlu1 %135 }
  0x77   :  { %vm140_vm1 = vcmp.eq.s32.totalorder %v133_v8, %v136_v9  ;;  %v145_v10 = vpop.xlane.xlu0 %144 }
  0x78   :  { %v149_v11 = vsub.f32 %v117_v1, %v145_v10  ;;  %v165_v12 = vsel %vm140_vm1, %v117_v1, 0.0 }
  0x79   :  { %v167_v13 = vsel %vm142_vm0, %v165_v12, 0.0 }
  0x7a   :  { %v151_v14 = vmul.f32 1.442695, %v149_v11  ;;  %168 = vadd.xlane.f32.xlu0 %v167_v13 }
  0x7c   :  { %243 = vpow2.f32 %v151_v14 }
  0x7e   :  { %v139_v15 = vpop.permute.xlu1 %138 }
  0x7f   :  { %vm141_vm2 = vcmp.eq.s32.totalorder %v133_v8, %v139_v15  ;;  %v148_v16 = vpop.xlane.xlu0 %147 }
  0x80   :  { %v150_v17 = vsub.f32 %v118_v4, %v148_v16  ;;  %v166_v18 = vsel %vm141_vm2, %v118_v4, 0.0 }
  0x81   :  { %v170_v19 = vsel %vm142_vm0, %v166_v18, 0.0 }
  0x82   :  { %v244_v20 = vpop.eup %243  ;;  %v153_v21 = vmul.f32 1.442695, %v150_v17  ;;  %171 = vadd.xlane.f32.xlu1 %v170_v19 }
  0x83   :  { %v155_v22 = vsel %vm142_vm0, %v244_v20, 0.0 }
  0x84   :  { %245 = vpow2.f32 %v153_v21  ;;  %156 = vadd.xlane.f32.xlu2 %v155_v22 }
  0x85   :  { %247 = vlog2.f32 %v121_v25 }
  0x86   :  { %249 = vlog2.f32 %v122_v26 }
  0x8a   :  { %v246_v23 = vpop.eup %245 }
  0x8b   :  { %v158_v24 = vsel %vm142_vm0, %v246_v23, 0.0  ;;  %v248_v28 = vpop.eup %247 }
  0x8c   :  { %159 = vadd.xlane.f32.xlu2 %v158_v24  ;;  %v250_v29 = vpop.eup %249  ;;  %v174_v30 = vmul.f32 0.6931472, %v248_v28 }
  0x8d   :  { %v176_v32 = vmul.f32 0.6931472, %v250_v29 }
  0xed   :  { %v169_v31 = vpop.xlane.xlu0 %168 }
  0xee   :  { %v177_v36 = vadd.f32 %v174_v30, %v169_v31 }
  0xf0   :  { %v179_v39 = vsub.f32 %v177_v36, %v145_v10 }
  0xf5   :  { %v172_v35 = vpop.xlane.xlu1 %171 }
  0xf6   :  { %v178_v37 = vadd.f32 %v176_v32, %v172_v35 }
  0xf7   :  { %v157_v27 = vpop.xlane.xlu2 %156 }
  0xf8   :  { %251 = vlog2.f32 %v157_v27  ;;  %v180_v41 = vsub.f32 %v178_v37, %v148_v16 }
  0xfe   :  { %v252_v34 = vpop.eup %251 }
  0xff   :  { %v160_v33 = vpop.xlane.xlu2 %159  ;;  %v162_v38 = vmul.f32 0.6931472, %v252_v34 }
 0x100   :  { %253 = vlog2.f32 %v160_v33 }
 0x101   :  { %v181_v42 = vsub.f32 %v179_v39, %v162_v38 }
 0x103   :  { %v187_v45 = vsel %vm186_vm3, %v181_v42, 0.0 }
 0x106   :  { %v254_v40 = vpop.eup %253 }
 0x107   :  { %v164_v43 = vmul.f32 0.6931472, %v254_v40 }
 0x109   :  { %v182_v44 = vsub.f32 %v180_v41, %v164_v43 }
 0x10b   :  { %v188_v46 = vsel %vm186_vm3, %v182_v44, 0.0 }
 0x10c   :  { %v189_v47 = vadd.f32 %v188_v46, %v187_v45 }
 0x10e   :  { %190 = vadd.xlane.f32.xlu2 %v189_v47 }
 0x181   :  { %v191_v48 = vpop.xlane.xlu2 %190 }
 0x182   :  { %v192_v49 = vrot.slane %v191_v48, 4 }
 0x184   :  { %v193_v50 = vadd.f32 %v192_v49, %v191_v48 }
 0x186   :  { %v194_v51 = vrot.slane %v193_v50, 2 }
 0x188   :  { %v195_v52 = vadd.f32 %v194_v51, %v193_v50 }
 0x18a   :  { %v196_v53 = vrot.slane %v195_v52, 1 }
 0x18c   :  { %v197_v54 = vadd.f32 %v196_v53, %v195_v52 }
 0x18e   :  { %236 = vpush %v197_v54 }
 0x1bf   :  { %s237_s26 = spop %236 }
 0x1c0   :  { %v199_v55 = vstv %s237_s26 }
 0x1c1   :  { %201 = vst [vmem:[#allocation2] sm:$0xff] %v199_v55 }
 0x1c2   :  { %212 = dma.vmem_to_hbm [thread:$0]  %s208_s22, 128, %s210_s25, [#allocation3]  }
 0x1c3   :  { %279 = dma.done.wait [#allocation3], 128  }
 0x1c4   :  { %280 = vsyncadd [#allocation3], 4294967168 }
 0x1c5   :  { %217 = vsyncpa [#allocation3], 1 }

</bundles_post_ra>
